<compile_context>
chip_gen: v5e
topology: v5e:2x2
jax: 0.10.0
libtpu: 0.0.40
codegen_flags: <defaults>
</compile_context>

<pallas_src>
import math

import jax
import jax.numpy as jnp
from jax.experimental import pallas as pl
from jax.experimental.pallas import tpu as pltpu


# ----------------------------- Pallas kernel --------------------------------
def qnet_kernel(x_ref, w1_ref, b1_ref, w2_ref, b2_ref, w3_ref, b3_ref,
                w4_ref, b4_ref, q_ref):
    # ---- fc_1 on the concatenated [s | a | plan] tile (single matmul) ------
    h = jnp.dot(x_ref[...], w1_ref[...],
                preferred_element_type=jnp.float32)              # (TB, 64)
    h = jnp.maximum(h + b1_ref[...], 0.0)

    # ---- fc_2 ---------------------------------------------------------------
    h = jnp.dot(h.astype(jnp.bfloat16), w2_ref[...],
                preferred_element_type=jnp.float32)              # (TB, 128)
    h = jnp.maximum(h + b2_ref[...], 0.0)

    # ---- fc_3 ---------------------------------------------------------------
    h = jnp.dot(h.astype(jnp.bfloat16), w3_ref[...],
                preferred_element_type=jnp.float32)              # (TB, 128)
    h = jnp.maximum(h + b3_ref[...], 0.0)

    # ---- out: (1,128) . (TB,128)^T on the MXU -> lane-dense (1, TB) row -----
    q = jax.lax.dot_general(
        w4_ref[...], h.astype(jnp.bfloat16),
        dimension_numbers=(((1,), (1,)), ((), ())),
        preferred_element_type=jnp.float32)                      # (1, TB)
    q_ref[...] = q + b4_ref[0]


# ----------------------------- wrapper ---------------------------------------
def _round_up(x, m):
    return ((x + m - 1) // m) * m


def prepare_qnet_params(params):
    """One-time repack of the f32 (din,dout) params into the kernel layout:
    bf16 MXU weights (f32 accumulation in-kernel), f32 row biases, the output
    layer stored as a (1,128) bf16 row, and its scalar bias as a (1,) f32
    array for SMEM."""
    (w1, b1), (w2, b2), (w3, b3), (w4, b4) = params
    return dict(
        w1=w1.astype(jnp.bfloat16),                   # (Sd+1+Pd, 64)
        b1=b1.reshape(1, -1).astype(jnp.float32),
        w2=w2.astype(jnp.bfloat16),                   # (64, 128)
        b2=b2.reshape(1, -1).astype(jnp.float32),
        w3=w3.astype(jnp.bfloat16),                   # (128, 128)
        b3=b3.reshape(1, -1).astype(jnp.float32),
        w4=w4.reshape(1, -1).astype(jnp.bfloat16),    # (1, 128) row
        b4=b4.reshape(-1).astype(jnp.float32),        # (1,)
    )


def qnet_forward(s, a, plan, prep):
    """Fused 4-layer MLP.  Batch is tiled over a 1-D 'parallel' grid; all
    weights/biases stay VMEM-resident via constant index_maps."""
    # Fused concat + bf16 cast (inputs are only consumed by bf16 MXU operands).
    x = jnp.concatenate(
        (s.astype(jnp.bfloat16),
         a.astype(jnp.bfloat16),
         plan.astype(jnp.bfloat16)), axis=1)          # (B, Sd+1+Pd)
    B, din = x.shape

    # Batch tile: multiple of 128 (lane-dense output row, full packed tiles),
    # capped at 512; >=2 grid steps when the batch allows (v7x megacore).
    b128 = _round_up(B, 128)
    if b128 <= 128:
        TB = 128
    else:
        TB = min(512, _round_up((b128 + 1) // 2, 128))
    Bp = _round_up(B, TB)
    if Bp != B:
        x = jnp.pad(x, ((0, Bp - B), (0, 0)))
    n_steps = Bp // TB

    def pinned_spec(w):                 # same block every step -> no re-DMA
        return pl.BlockSpec(w.shape, lambda i: (0, 0))

    smem_spec = pl.BlockSpec(memory_space=pltpu.MemorySpace.SMEM)

    q_row = pl.pallas_call(
        qnet_kernel,
        out_shape=jax.ShapeDtypeStruct((1, Bp), jnp.float32),
        grid=(n_steps,),
        in_specs=[
            pl.BlockSpec((TB, din), lambda i: (i, 0)),
            pinned_spec(prep["w1"]), pinned_spec(prep["b1"]),
            pinned_spec(prep["w2"]), pinned_spec(prep["b2"]),
            pinned_spec(prep["w3"]), pinned_spec(prep["b3"]),
            pinned_spec(prep["w4"]), smem_spec,
        ],
        out_specs=pl.BlockSpec((1, TB), lambda i: (0, i)),
        compiler_params=pltpu.CompilerParams(
            dimension_semantics=("parallel",)),
    )(x,
      prep["w1"], prep["b1"],
      prep["w2"], prep["b2"],
      prep["w3"], prep["b3"],
      prep["w4"], prep["b4"])

    # Padded batch rows produce garbage values; slice them off.
    return q_row[0, :B].reshape(B, 1)


# --------------------------- parameter init ----------------------------------
def xavier_uniform_relu(key, din, dout):
    """Matches nn.init.xavier_uniform_(W, gain=calculate_gain('relu')) on a
    PyTorch Linear weight of shape (dout, din); returned transposed (din,dout)
    for the x @ W convention. Bias is zero-filled."""
    gain = math.sqrt(2.0)  # relu gain
    bound = gain * math.sqrt(6.0 / (din + dout))
    w = jax.random.uniform(key, (dout, din), jnp.float32, -bound, bound)
    b = jnp.zeros((1, dout), jnp.float32)
    return w.T, b


def init_qnet_params(key, state_dim, plan_dim):
    din = state_dim + 1 + plan_dim
    k1, k2, k3, k4 = jax.random.split(key, 4)
    return (
        xavier_uniform_relu(k1, din, 64),
        xavier_uniform_relu(k2, 64, 128),
        xavier_uniform_relu(k3, 128, 128),
        xavier_uniform_relu(k4, 128, 1),
    )


# --------------------------------- main --------------------------------------
if __name__ == "__main__":
    # Small shapes consistent with the module: State_dim=5, plan_dim=10, B=8.
    STATE_DIM = 5
    PLAN_DIM = 10
    BATCH = 8

    key = jax.random.PRNGKey(0)
    k_params, k_s, k_a, k_plan = jax.random.split(key, 4)

    params = init_qnet_params(k_params, STATE_DIM, PLAN_DIM)
    prep = prepare_qnet_params(params)

    s = jax.random.normal(k_s, (BATCH, STATE_DIM), jnp.float32)
    a = jax.random.normal(k_a, (BATCH, 1), jnp.float32)
    plan = jax.random.normal(k_plan, (BATCH, PLAN_DIM), jnp.float32)

    q = qnet_forward(s, a, plan, prep)
    q = jax.block_until_ready(q)
    assert q.shape == (BATCH, 1)

    # (1) Pure-JAX reference with the SAME dtype policy as the kernel
    #     (bf16 matmul operands incl. the concatenated input and the output
    #     row, f32 accumulation) -> tight tolerance.
    def reference_bf16(s, a, plan, p):
        x = jnp.concatenate((s, a, plan), axis=1).astype(jnp.bfloat16)
        h = jnp.dot(x, p["w1"], preferred_element_type=jnp.float32)
        h = jnp.maximum(h + p["b1"], 0.0)
        h = jnp.dot(h.astype(jnp.bfloat16), p["w2"],
                    preferred_element_type=jnp.float32)
        h = jnp.maximum(h + p["b2"], 0.0)
        h = jnp.dot(h.astype(jnp.bfloat16), p["w3"],
                    preferred_element_type=jnp.float32)
        h = jnp.maximum(h + p["b3"], 0.0)
        qq = jnp.dot(h.astype(jnp.bfloat16), p["w4"].T,
                     preferred_element_type=jnp.float32)
        return qq + p["b4"][0]

    q_ref = reference_bf16(s, a, plan, prep)
    assert jnp.allclose(q, q_ref, atol=5e-4, rtol=5e-4), \
        float(jnp.max(jnp.abs(q - q_ref)))

    # (2) Loose sanity check vs. full-f32 PyTorch semantics (guards against
    #     structural bugs, e.g. a wrong concat order); tolerance accounts for
    #     the intentional bf16 matmul operands.
    x = jnp.concatenate((s, a, plan), axis=1)
    h = x
    for i, (w, b) in enumerate(params):
        h = h @ w + b
        if i < 3:
            h = jnp.maximum(h, 0.0)
    assert jnp.allclose(q, h, atol=1e-1, rtol=1e-1)

    print("KERNEL_OK")
</pallas_src>

<mosaic_0001>
module attributes {stable_mosaic.version = 11 : i64} {
  func.func @qnet_kernel(%arg0: i32, %arg1: memref<128x16xbf16, #tpu.memory_space<vmem>>, %arg2: memref<16x64xbf16, #tpu.memory_space<vmem>>, %arg3: memref<1x64xf32, #tpu.memory_space<vmem>>, %arg4: memref<64x128xbf16, #tpu.memory_space<vmem>>, %arg5: memref<1x128xf32, #tpu.memory_space<vmem>>, %arg6: memref<128x128xbf16, #tpu.memory_space<vmem>>, %arg7: memref<1x128xf32, #tpu.memory_space<vmem>>, %arg8: memref<1x128xbf16, #tpu.memory_space<vmem>>, %arg9: memref<1xf32, #tpu.memory_space<smem>>, %arg10: memref<1x128xf32, #tpu.memory_space<vmem>>) attributes {dimension_semantics = [#tpu.dimension_semantics<parallel>], iteration_bounds = array<i64: 1>, scalar_prefetch = 0 : i64, scratch_operands = 0 : i64, tpu.core_type = #tpu.core_type<tc>, window_params = [{transform_indices = @transform_0, window_bounds = array<i64: 128, 16>}, {pipeline_mode = #tpu.pipeline_mode<synchronous>, transform_indices = @transform_1, window_bounds = array<i64: 16, 64>}, {pipeline_mode = #tpu.pipeline_mode<synchronous>, transform_indices = @transform_2, window_bounds = array<i64: 1, 64>}, {pipeline_mode = #tpu.pipeline_mode<synchronous>, transform_indices = @transform_3, window_bounds = array<i64: 64, 128>}, {pipeline_mode = #tpu.pipeline_mode<synchronous>, transform_indices = @transform_4, window_bounds = array<i64: 1, 128>}, {pipeline_mode = #tpu.pipeline_mode<synchronous>, transform_indices = @transform_5, window_bounds = array<i64: 128, 128>}, {pipeline_mode = #tpu.pipeline_mode<synchronous>, transform_indices = @transform_6, window_bounds = array<i64: 1, 128>}, {pipeline_mode = #tpu.pipeline_mode<synchronous>, transform_indices = @transform_7, window_bounds = array<i64: 1, 128>}, {transform_indices = @transform_8, window_bounds = array<i64: 1>}, {transform_indices = @transform_9, window_bounds = array<i64: 1, 128>}]} {
    %c0 = arith.constant 0 : index
    %c0_0 = arith.constant 0 : index
    %0 = vector.load %arg1[%c0, %c0_0] : memref<128x16xbf16, #tpu.memory_space<vmem>>, vector<128x16xbf16>
    %c0_1 = arith.constant 0 : index
    %c0_2 = arith.constant 0 : index
    %1 = vector.load %arg2[%c0_1, %c0_2] : memref<16x64xbf16, #tpu.memory_space<vmem>>, vector<16x64xbf16>
    %cst = arith.constant dense<0.000000e+00> : vector<128x64xf32>
    %2 = tpu.matmul %0, %1, %cst {dimension_numbers = #tpu.dot_dimension_numbers<[1], [0], [0], [1], [0, 0, 1, 1], [], []>} : vector<128x16xbf16>, vector<16x64xbf16>, vector<128x64xf32> -> vector<128x64xf32>
    %c0_3 = arith.constant 0 : index
    %c0_4 = arith.constant 0 : index
    %3 = vector.load %arg3[%c0_3, %c0_4] : memref<1x64xf32, #tpu.memory_space<vmem>>, vector<1x64xf32>
    %4 = vector.broadcast %3 : vector<1x64xf32> to vector<128x64xf32>
    %5 = arith.addf %2, %4 : vector<128x64xf32>
    %cst_5 = arith.constant 0.000000e+00 : f32
    %6 = vector.broadcast %cst_5 : f32 to vector<128x64xf32>
    %7 = arith.maximumf %5, %6 : vector<128x64xf32>
    %8 = arith.truncf %7 : vector<128x64xf32> to vector<128x64xbf16>
    %c0_6 = arith.constant 0 : index
    %c0_7 = arith.constant 0 : index
    %9 = vector.load %arg4[%c0_6, %c0_7] : memref<64x128xbf16, #tpu.memory_space<vmem>>, vector<64x128xbf16>
    %cst_8 = arith.constant dense<0.000000e+00> : vector<128x128xf32>
    %10 = tpu.matmul %8, %9, %cst_8 {dimension_numbers = #tpu.dot_dimension_numbers<[1], [0], [0], [1], [0, 0, 1, 1], [], []>} : vector<128x64xbf16>, vector<64x128xbf16>, vector<128x128xf32> -> vector<128x128xf32>
    %c0_9 = arith.constant 0 : index
    %c0_10 = arith.constant 0 : index
    %11 = vector.load %arg5[%c0_9, %c0_10] : memref<1x128xf32, #tpu.memory_space<vmem>>, vector<1x128xf32>
    %12 = vector.broadcast %11 : vector<1x128xf32> to vector<128x128xf32>
    %13 = arith.addf %10, %12 : vector<128x128xf32>
    %cst_11 = arith.constant 0.000000e+00 : f32
    %14 = vector.broadcast %cst_11 : f32 to vector<128x128xf32>
    %15 = arith.maximumf %13, %14 : vector<128x128xf32>
    %16 = arith.truncf %15 : vector<128x128xf32> to vector<128x128xbf16>
    %c0_12 = arith.constant 0 : index
    %c0_13 = arith.constant 0 : index
    %17 = vector.load %arg6[%c0_12, %c0_13] : memref<128x128xbf16, #tpu.memory_space<vmem>>, vector<128x128xbf16>
    %cst_14 = arith.constant dense<0.000000e+00> : vector<128x128xf32>
    %18 = tpu.matmul %16, %17, %cst_14 {dimension_numbers = #tpu.dot_dimension_numbers<[1], [0], [0], [1], [0, 0, 1, 1], [], []>} : vector<128x128xbf16>, vector<128x128xbf16>, vector<128x128xf32> -> vector<128x128xf32>
    %c0_15 = arith.constant 0 : index
    %c0_16 = arith.constant 0 : index
    %19 = vector.load %arg7[%c0_15, %c0_16] : memref<1x128xf32, #tpu.memory_space<vmem>>, vector<1x128xf32>
    %20 = vector.broadcast %19 : vector<1x128xf32> to vector<128x128xf32>
    %21 = arith.addf %18, %20 : vector<128x128xf32>
    %cst_17 = arith.constant 0.000000e+00 : f32
    %22 = vector.broadcast %cst_17 : f32 to vector<128x128xf32>
    %23 = arith.maximumf %21, %22 : vector<128x128xf32>
    %c0_18 = arith.constant 0 : index
    %c0_19 = arith.constant 0 : index
    %24 = vector.load %arg8[%c0_18, %c0_19] : memref<1x128xbf16, #tpu.memory_space<vmem>>, vector<1x128xbf16>
    %25 = arith.truncf %23 : vector<128x128xf32> to vector<128x128xbf16>
    %cst_20 = arith.constant dense<0.000000e+00> : vector<1x128xf32>
    %26 = tpu.matmul %24, %25, %cst_20 {dimension_numbers = #tpu.dot_dimension_numbers<[1], [1], [0], [0], [0, 0, 1, 0], [], []>} : vector<1x128xbf16>, vector<128x128xbf16>, vector<1x128xf32> -> vector<1x128xf32>
    %c0_21 = arith.constant 0 : index
    %27 = memref.load %arg9[%c0_21] : memref<1xf32, #tpu.memory_space<smem>>
    %28 = vector.broadcast %27 : f32 to vector<1x128xf32>
    %29 = arith.addf %26, %28 : vector<1x128xf32>
    %c0_22 = arith.constant 0 : index
    %c0_23 = arith.constant 0 : index
    %30 = vector.load %arg10[%c0_22, %c0_23] : memref<1x128xf32, #tpu.memory_space<vmem>>, vector<1x128xf32>
    tpu.vector_store %arg10[%c0_22, %c0_23], %29 {strides = array<i32>} : memref<1x128xf32, #tpu.memory_space<vmem>>, vector<1x128xf32>,
    return
  }
  func.func @transform_0(%arg0: i32) -> (i32, i32) {
    %c0_i32 = arith.constant 0 : i32
    %c0_i32_0 = arith.constant 0 : i32
    return %arg0, %c0_i32 : i32, i32
  }
  func.func @transform_1(%arg0: i32) -> (i32, i32) {
    %c0_i32 = arith.constant 0 : i32
    %c0_i32_0 = arith.constant 0 : i32
    %c0_i32_1 = arith.constant 0 : i32
    return %c0_i32, %c0_i32_0 : i32, i32
  }
  func.func @transform_2(%arg0: i32) -> (i32, i32) {
    %c0_i32 = arith.constant 0 : i32
    %c0_i32_0 = arith.constant 0 : i32
    %c0_i32_1 = arith.constant 0 : i32
    return %c0_i32, %c0_i32_0 : i32, i32
  }
  func.func @transform_3(%arg0: i32) -> (i32, i32) {
    %c0_i32 = arith.constant 0 : i32
    %c0_i32_0 = arith.constant 0 : i32
    %c0_i32_1 = arith.constant 0 : i32
    return %c0_i32, %c0_i32_0 : i32, i32
  }
  func.func @transform_4(%arg0: i32) -> (i32, i32) {
    %c0_i32 = arith.constant 0 : i32
    %c0_i32_0 = arith.constant 0 : i32
    %c0_i32_1 = arith.constant 0 : i32
    return %c0_i32, %c0_i32_0 : i32, i32
  }
  func.func @transform_5(%arg0: i32) -> (i32, i32) {
    %c0_i32 = arith.constant 0 : i32
    %c0_i32_0 = arith.constant 0 : i32
    %c0_i32_1 = arith.constant 0 : i32
    return %c0_i32, %c0_i32_0 : i32, i32
  }
  func.func @transform_6(%arg0: i32) -> (i32, i32) {
    %c0_i32 = arith.constant 0 : i32
    %c0_i32_0 = arith.constant 0 : i32
    %c0_i32_1 = arith.constant 0 : i32
    return %c0_i32, %c0_i32_0 : i32, i32
  }
  func.func @transform_7(%arg0: i32) -> (i32, i32) {
    %c0_i32 = arith.constant 0 : i32
    %c0_i32_0 = arith.constant 0 : i32
    %c0_i32_1 = arith.constant 0 : i32
    return %c0_i32, %c0_i32_0 : i32, i32
  }
  func.func @transform_8(%arg0: i32) -> i32 {
    %c0_i32 = arith.constant 0 : i32
    %c0_i32_0 = arith.constant 0 : i32
    return %c0_i32 : i32
  }
  func.func @transform_9(%arg0: i32) -> (i32, i32) {
    %c0_i32 = arith.constant 0 : i32
    %c0_i32_0 = arith.constant 0 : i32
    return %c0_i32, %arg0 : i32, i32
  }
}

</mosaic_0001>

<bundles_post_ra>
// kernel: tpu_custom_call.1
= control target key start
LH: loop header
LB: loop body
LE: loop exit
PB: predicated region body
PF: predicated region fallthrough
CT: control target
= control target key end

     0   :  { %15 = vsyncpa [#allocation4], 0  ;;  %s866_s0 = inlined_call_operand.vmem [shape: bf16[128,16], index: 0, kind: input, shape index: {}]   ;;  %s867_s1 = inlined_call_operand.vmem [shape: bf16[16,64], index: 1, kind: input, shape index: {}]   ;;  %s868_s2 = inlined_call_operand.vmem [shape: f32[1,64], index: 2, kind: input, shape index: {}]   ;;  %s869_s3 = inlined_call_operand.hbm [shape: bf16[64,128], index: 3, kind: input, shape index: {}]   ;;  %s870_s4 = inlined_call_operand.vmem [shape: f32[1,128], index: 4, kind: input, shape index: {}]   ;;  %s871_s5 = inlined_call_operand.vmem [shape: bf16[128,128], index: 5, kind: input, shape index: {}]   ;;  %s872_s6 = inlined_call_operand.vmem [shape: f32[1,128], index: 6, kind: input, shape index: {}]   ;;  %s873_s7 = inlined_call_operand.vmem [shape: bf16[1,128], index: 7, kind: input, shape index: {}]   ;;  %s874_s8 = inlined_call_operand.<no memory space> [shape: f32[1], index: 8, kind: input, shape index: {}]   ;;  %s875_s9 = inlined_call_operand.hbm [shape: f32[1,128], index: 9, kind: output, shape index: {}]  }
   0x1   :  { %16 = vsyncpa [#allocation5], 0  ;;  %s27_s11 = sshll.u32 %s869_s3, 4  ;;  %s706_s12 = smov [#allocation3]   ;;  %s28_s11 = int_to_ptr.hbm [resolvable:$true] %s27_s11 }
   0x2   :  { %s29_s13 = sshll.u32 %s706_s12, 4  ;;  %s707_s14 = smov 64   ;;  %s30_s13 = int_to_ptr.vmem [resolvable:$true] %s29_s13 }
   0x3   :  { %s708_s15 = smov 4  }
   0x4   :  { %35 = dma.hbm_to_vmem [thread:$0]  %s28_s11, 512, %s30_s13, [#allocation4], %s707_s14, %s707_s14, %s708_s15  }
   0x5   :  { %702 = dma.done.wait [#allocation4], 512  }
   0x6   :  { %703 = vsyncadd [#allocation4], 4294966784  ;;  %v634_v0 = vld [vmem:[%s867_s1] sm:$0xff]  ;;  %vm119_vm0 = vcmask 130048   ;;  %v627_v2 = vld [vmem:[%s866_s0 + $0x8] sm:$0xff]  ;;  %vm253_vm1 = vcmask 523264  }
   0x7   :  { %v626_v1 = vld [vmem:[%s866_s0] sm:$0xff]  ;;  %151 = vmatpush.bf16.msra.mxu0 %v634_v0  ;;  %v628_v3 = vld [vmem:[%s866_s0 + $0x10] sm:$0xff]  ;;  %v629_v4 = vld [vmem:[%s866_s0 + $0x18] sm:$0xff]  ;;  %s709_s30 = smov [#allocation6]  }
   0x8   :  { %v630_v5 = vld [vmem:[%s866_s0 + $0x20] sm:$0xff]  ;;  %v631_v6 = vld [vmem:[%s866_s0 + $0x28] sm:$0xff]  ;;  %v638_v7 = vld [vmem:[#allocation3 + $0x18] sm:$0xff]  ;;  %s514_s10 = sshll.u32 %s709_s30, 4  ;;  %s515_s10 = int_to_ptr.vmem [resolvable:$true] %s514_s10 }
   0x9   :  { %v632_v8 = vld [vmem:[%s866_s0 + $0x30] sm:$0xff]  ;;  %282 = vmatpush.bf16.msra.mxu1 %v638_v7  ;;  %v636_v10 = vld [vmem:[#allocation3 + $0x8] sm:$0xff]  ;;  %v635_v11 = vld [vmem:[#allocation3] sm:$0xff] }
   0xa   :  { %562 = vmatmul.msk.bf16.vlgmr.msra.gmra.mxu0 %vm119_vm0, %v626_v1  ;;  %v637_v9 = vld [vmem:[#allocation3 + $0x10] sm:$0xff]  ;;  %v633_v12 = vld [vmem:[%s866_s0 + $0x38] sm:$0xff]  ;;  %v801_v14 = vld [vmem:[%s868_s2] ss:$0 sm:$0xff]  ;;  %s516_s0 = sshll.u32 %s875_s9, 4  ;;  %s517_s0 = int_to_ptr.hbm [resolvable:$true] %s516_s0 }
   0xb   :  { %v646_v53 = vld [vmem:[%s871_s5 + $0x38] sm:$0xff]  ;;  %v645_v57 = vld [vmem:[%s871_s5 + $0x30] sm:$0xff]  ;;  %v644_v59 = vld [vmem:[%s871_s5 + $0x28] sm:$0xff] }
   0xc   :  { %419 = vmatpush.bf16.msra.mxu2 %v646_v53  ;;  %v643_v60 = vld [vmem:[%s871_s5 + $0x20] sm:$0xff]  ;;  %v642_v0 = vld [vmem:[%s871_s5 + $0x18] sm:$0xff] }
   0xd   :  { %283 = vmatpush.bf16.msra.mxu1 %v637_v9  ;;  %v639_v7 = vld [vmem:[%s871_s5] sm:$0xff] }
  0x10   :  { %420 = vmatpush.bf16.msra.mxu2 %v645_v57 }
  0x11   :  { %284 = vmatpush.bf16.msra.mxu1 %v636_v10 }
  0x14   :  { %421 = vmatpush.bf16.msra.mxu2 %v644_v59 }
  0x15   :  { %285 = vmatpush.bf16.msra.mxu1 %v635_v11 }
  0x18   :  { %422 = vmatpush.bf16.msra.mxu2 %v643_v60 }
  0x1a   :  { %563 = vmatmul.msk.bf16.gmra.mxu0 %vm119_vm0, %v627_v2 }
  0x1c   :  { %423 = vmatpush.bf16.msra.mxu2 %v642_v0 }
  0x2a   :  { %564 = vmatmul.msk.bf16.gmra.mxu0 %vm119_vm0, %v628_v3 }
  0x3a   :  { %565 = vmatmul.msk.bf16.gmra.mxu0 %vm119_vm0, %v629_v4  ;;  %v641_v4 = vld [vmem:[%s871_s5 + $0x10] sm:$0xff] }
  0x3b   :  { %424 = vmatpush.bf16.msra.mxu2 %v641_v4 }
  0x4a   :  { %566 = vmatmul.msk.bf16.gmra.mxu0 %vm119_vm0, %v630_v5 }
  0x5a   :  { %567 = vmatmul.msk.bf16.gmra.mxu0 %vm119_vm0, %v631_v6  ;;  %v640_v6 = vld [vmem:[%s871_s5 + $0x8] sm:$0xff] }
  0x5b   :  { %425 = vmatpush.bf16.msra.mxu2 %v640_v6 }
  0x5f   :  { %426 = vmatpush.bf16.msra.mxu2 %v639_v7 }
  0x6a   :  { %568 = vmatmul.msk.bf16.gmra.mxu0 %vm119_vm0, %v632_v8 }
  0x7a   :  { %569 = vmatmul.msk.bf16.gmra.mxu0 %vm119_vm0, %v633_v12 }
  0x87   :  { %v153_v13 = vpop.f32.mrf.mxu0 }
  0x88   :  { %v154_v15 = vadd.f32 %v801_v14, %v153_v13 }
  0x8a   :  { %v193_v18 = vmax.f32 %v154_v15, 0.0 }
  0x8f   :  { %v155_v16 = vpop.f32.mrf.mxu0 }
  0x90   :  { %v156_v17 = vadd.f32 %v801_v14, %v155_v16  ;;  %v652_v16 = vld [vmem:[%s870_s4] ss:$0 sm:$0xff] }
  0x92   :  { %v194_v19 = vmax.f32 %v156_v17, 0.0 }
  0x94   :  { %v209_v20 = vpack.c.bf16 %v194_v19, %v193_v18 }
  0x96   :  { %586 = vmatmul.msk.bf16.vlgmr.msra.gmra.mxu1 %vm253_vm1, %v209_v20 }
  0x97   :  { %v158_v21 = vpop.f32.mrf.mxu0 }
  0x98   :  { %v159_v22 = vadd.f32 %v801_v14, %v158_v21 }
  0x9a   :  { %v195_v25 = vmax.f32 %v159_v22, 0.0 }
  0x9f   :  { %v160_v23 = vpop.f32.mrf.mxu0 }
  0xa0   :  { %v161_v24 = vadd.f32 %v801_v14, %v160_v23 }
  0xa2   :  { %v196_v26 = vmax.f32 %v161_v24, 0.0 }
  0xa4   :  { %v210_v27 = vpack.c.bf16 %v196_v26, %v195_v25 }
  0xa6   :  { %587 = vmatmul.msk.bf16.gmra.mxu1 %vm253_vm1, %v210_v27 }
  0xa7   :  { %v163_v28 = vpop.f32.mrf.mxu0 }
  0xa8   :  { %v164_v29 = vadd.f32 %v801_v14, %v163_v28 }
  0xaa   :  { %v197_v32 = vmax.f32 %v164_v29, 0.0 }
  0xaf   :  { %v165_v30 = vpop.f32.mrf.mxu0 }
  0xb0   :  { %v166_v31 = vadd.f32 %v801_v14, %v165_v30 }
  0xb2   :  { %v198_v33 = vmax.f32 %v166_v31, 0.0 }
  0xb4   :  { %v211_v34 = vpack.c.bf16 %v198_v33, %v197_v32 }
  0xb6   :  { %588 = vmatmul.msk.bf16.gmra.mxu1 %vm253_vm1, %v211_v34 }
  0xb7   :  { %v168_v35 = vpop.f32.mrf.mxu0 }
  0xb8   :  { %v169_v36 = vadd.f32 %v801_v14, %v168_v35 }
  0xba   :  { %v199_v39 = vmax.f32 %v169_v36, 0.0 }
  0xbf   :  { %v170_v37 = vpop.f32.mrf.mxu0 }
  0xc0   :  { %v171_v38 = vadd.f32 %v801_v14, %v170_v37 }
  0xc2   :  { %v200_v40 = vmax.f32 %v171_v38, 0.0 }
  0xc4   :  { %v212_v41 = vpack.c.bf16 %v200_v40, %v199_v39 }
  0xc6   :  { %589 = vmatmul.msk.bf16.gmra.mxu1 %vm253_vm1, %v212_v41 }
  0xc7   :  { %v173_v42 = vpop.f32.mrf.mxu0 }
  0xc8   :  { %v174_v43 = vadd.f32 %v801_v14, %v173_v42 }
  0xca   :  { %v201_v46 = vmax.f32 %v174_v43, 0.0 }
  0xcf   :  { %v175_v44 = vpop.f32.mrf.mxu0 }
  0xd0   :  { %v176_v45 = vadd.f32 %v801_v14, %v175_v44 }
  0xd2   :  { %v202_v47 = vmax.f32 %v176_v45, 0.0 }
  0xd4   :  { %v213_v48 = vpack.c.bf16 %v202_v47, %v201_v46 }
  0xd6   :  { %590 = vmatmul.msk.bf16.gmra.mxu1 %vm253_vm1, %v213_v48 }
  0xd7   :  { %v178_v49 = vpop.f32.mrf.mxu0 }
  0xd8   :  { %v179_v50 = vadd.f32 %v801_v14, %v178_v49 }
  0xda   :  { %v203_v54 = vmax.f32 %v179_v50, 0.0 }
  0xdf   :  { %v180_v51 = vpop.f32.mrf.mxu0 }
  0xe0   :  { %v181_v52 = vadd.f32 %v801_v14, %v180_v51 }
  0xe2   :  { %v204_v55 = vmax.f32 %v181_v52, 0.0 }
  0xe4   :  { %v214_v56 = vpack.c.bf16 %v204_v55, %v203_v54 }
  0xe6   :  { %591 = vmatmul.msk.bf16.gmra.mxu1 %vm253_vm1, %v214_v56 }
  0xe7   :  { %v183_v58 = vpop.f32.mrf.mxu0 }
  0xe8   :  { %v184_v61 = vadd.f32 %v801_v14, %v183_v58 }
  0xea   :  { %v205_v1 = vmax.f32 %v184_v61, 0.0 }
  0xef   :  { %v185_v62 = vpop.f32.mrf.mxu0 }
  0xf0   :  { %v186_v63 = vadd.f32 %v801_v14, %v185_v62 }
  0xf2   :  { %v206_v2 = vmax.f32 %v186_v63, 0.0 }
  0xf4   :  { %v215_v3 = vpack.c.bf16 %v206_v2, %v205_v1 }
  0xf6   :  { %592 = vmatmul.msk.bf16.gmra.mxu1 %vm253_vm1, %v215_v3 }
  0xf7   :  { %v188_v5 = vpop.f32.mrf.mxu0 }
  0xf8   :  { %v189_v8 = vadd.f32 %v801_v14, %v188_v5 }
  0xfa   :  { %v207_v11 = vmax.f32 %v189_v8, 0.0  ;;  %v653_v8 = vld [vmem:[%s872_s6] ss:$0 sm:$0xff] }
  0xff   :  { %v190_v9 = vpop.f32.mrf.mxu0 }
 0x100   :  { %v191_v10 = vadd.f32 %v801_v14, %v190_v9 }
 0x102   :  { %v208_v12 = vmax.f32 %v191_v10, 0.0 }
 0x104   :  { %v216_v13 = vpack.c.bf16 %v208_v12, %v207_v11 }
 0x106   :  { %593 = vmatmul.msk.bf16.gmra.mxu1 %vm253_vm1, %v216_v13 }
 0x113   :  { %v287_v15 = vpop.f32.mrf.mxu1 }
 0x114   :  { %v288_v17 = vadd.f32 %v652_v16, %v287_v15 }
 0x116   :  { %v327_v20 = vmax.f32 %v288_v17, 0.0 }
 0x11b   :  { %v289_v18 = vpop.f32.mrf.mxu1 }
 0x11c   :  { %v290_v19 = vadd.f32 %v652_v16, %v289_v18 }
 0x11e   :  { %v328_v21 = vmax.f32 %v290_v19, 0.0 }
 0x120   :  { %v343_v22 = vpack.c.bf16 %v328_v21, %v327_v20 }
 0x122   :  { %427 = vmatmul.bf16.vlgmr.msra.gmra.mxu2 %v343_v22 }
 0x123   :  { %v292_v23 = vpop.f32.mrf.mxu1 }
 0x124   :  { %v293_v24 = vadd.f32 %v652_v16, %v292_v23 }
 0x126   :  { %v329_v26 = vmax.f32 %v293_v24, 0.0 }
 0x12b   :  { %v294_v14 = vpop.f32.mrf.mxu1 }
 0x12c   :  { %v295_v25 = vadd.f32 %v652_v16, %v294_v14 }
 0x12e   :  { %v330_v27 = vmax.f32 %v295_v25, 0.0 }
 0x130   :  { %v344_v28 = vpack.c.bf16 %v330_v27, %v329_v26 }
 0x132   :  { %432 = vmatmul.bf16.gmra.mxu2 %v344_v28 }
 0x133   :  { %v297_v29 = vpop.f32.mrf.mxu1 }
 0x134   :  { %v298_v30 = vadd.f32 %v652_v16, %v297_v29 }
 0x136   :  { %v331_v33 = vmax.f32 %v298_v30, 0.0 }
 0x13b   :  { %v299_v31 = vpop.f32.mrf.mxu1 }
 0x13c   :  { %v300_v32 = vadd.f32 %v652_v16, %v299_v31 }
 0x13e   :  { %v332_v34 = vmax.f32 %v300_v32, 0.0 }
 0x140   :  { %v345_v35 = vpack.c.bf16 %v332_v34, %v331_v33 }
 0x142   :  { %437 = vmatmul.bf16.gmra.mxu2 %v345_v35 }
 0x143   :  { %v302_v36 = vpop.f32.mrf.mxu1 }
 0x144   :  { %v303_v37 = vadd.f32 %v652_v16, %v302_v36 }
 0x146   :  { %v333_v40 = vmax.f32 %v303_v37, 0.0 }
 0x14b   :  { %v304_v38 = vpop.f32.mrf.mxu1 }
 0x14c   :  { %v305_v39 = vadd.f32 %v652_v16, %v304_v38 }
 0x14e   :  { %v334_v41 = vmax.f32 %v305_v39, 0.0 }
 0x150   :  { %v346_v42 = vpack.c.bf16 %v334_v41, %v333_v40 }
 0x152   :  { %442 = vmatmul.bf16.gmra.mxu2 %v346_v42 }
 0x153   :  { %v307_v43 = vpop.f32.mrf.mxu1 }
 0x154   :  { %v308_v44 = vadd.f32 %v652_v16, %v307_v43 }
 0x156   :  { %v335_v47 = vmax.f32 %v308_v44, 0.0 }
 0x15b   :  { %v309_v45 = vpop.f32.mrf.mxu1 }
 0x15c   :  { %v310_v46 = vadd.f32 %v652_v16, %v309_v45 }
 0x15e   :  { %v336_v48 = vmax.f32 %v310_v46, 0.0 }
 0x160   :  { %v347_v49 = vpack.c.bf16 %v336_v48, %v335_v47 }
 0x162   :  { %447 = vmatmul.bf16.gmra.mxu2 %v347_v49 }
 0x163   :  { %v312_v50 = vpop.f32.mrf.mxu1 }
 0x164   :  { %v313_v51 = vadd.f32 %v652_v16, %v312_v50 }
 0x166   :  { %v337_v54 = vmax.f32 %v313_v51, 0.0 }
 0x16b   :  { %v314_v52 = vpop.f32.mrf.mxu1 }
 0x16c   :  { %v315_v53 = vadd.f32 %v652_v16, %v314_v52 }
 0x16e   :  { %v338_v55 = vmax.f32 %v315_v53, 0.0 }
 0x170   :  { %v348_v56 = vpack.c.bf16 %v338_v55, %v337_v54 }
 0x172   :  { %452 = vmatmul.bf16.gmra.mxu2 %v348_v56 }
 0x173   :  { %v317_v57 = vpop.f32.mrf.mxu1 }
 0x174   :  { %v318_v58 = vadd.f32 %v652_v16, %v317_v57 }
 0x176   :  { %v339_v61 = vmax.f32 %v318_v58, 0.0 }
 0x17b   :  { %v319_v59 = vpop.f32.mrf.mxu1 }
 0x17c   :  { %v320_v60 = vadd.f32 %v652_v16, %v319_v59 }
 0x17e   :  { %v340_v62 = vmax.f32 %v320_v60, 0.0 }
 0x180   :  { %v349_v63 = vpack.c.bf16 %v340_v62, %v339_v61 }
 0x182   :  { %457 = vmatmul.bf16.gmra.mxu2 %v349_v63 }
 0x183   :  { %v322_v0 = vpop.f32.mrf.mxu1 }
 0x184   :  { %v323_v1 = vadd.f32 %v652_v16, %v322_v0  ;;  %v484_v0 = vld [vmem:[%s873_s7] sm:$0x1] }
 0x186   :  { %v341_v4 = vmax.f32 %v323_v1, 0.0  ;;  %v494_v1 = vstv %s874_s8 }
 0x18b   :  { %v324_v2 = vpop.f32.mrf.mxu1 }
 0x18c   :  { %v325_v3 = vadd.f32 %v652_v16, %v324_v2 }
 0x18e   :  { %v342_v5 = vmax.f32 %v325_v3, 0.0 }
 0x190   :  { %v350_v6 = vpack.c.bf16 %v342_v5, %v341_v4 }
 0x192   :  { %462 = vmatmul.bf16.gmra.mxu2 %v350_v6 }
 0x1a5   :  { %v428_v7 = vpop.f32.mrf.mxu2 }
 0x1a6   :  { %v429_v9 = vadd.f32 %v653_v8, %v428_v7 }
 0x1a8   :  { %v468_v12 = vmax.f32 %v429_v9, 0.0 }
 0x1ad   :  { %v430_v10 = vpop.f32.mrf.mxu2 }
 0x1ae   :  { %v431_v11 = vadd.f32 %v653_v8, %v430_v10 }
 0x1b0   :  { %v469_v13 = vmax.f32 %v431_v11, 0.0 }
 0x1b2   :  { %v485_v15 = vpack.c.bf16 %v469_v13, %v468_v12 }
 0x1b5   :  { %v433_v17 = vpop.f32.mrf.mxu2 }
 0x1b6   :  { %v434_v18 = vadd.f32 %v653_v8, %v433_v17 }
 0x1b8   :  { %v470_v16 = vmax.f32 %v434_v18, 0.0 }
 0x1bd   :  { %v435_v19 = vpop.f32.mrf.mxu2 }
 0x1be   :  { %v436_v20 = vadd.f32 %v653_v8, %v435_v19 }
 0x1c0   :  { %v471_v21 = vmax.f32 %v436_v20, 0.0 }
 0x1c2   :  { %v486_v22 = vpack.c.bf16 %v471_v21, %v470_v16 }
 0x1c5   :  { %v438_v23 = vpop.f32.mrf.mxu2 }
 0x1c6   :  { %v439_v24 = vadd.f32 %v653_v8, %v438_v23 }
 0x1c8   :  { %v472_v26 = vmax.f32 %v439_v24, 0.0 }
 0x1cd   :  { %v440_v14 = vpop.f32.mrf.mxu2 }
 0x1ce   :  { %v441_v25 = vadd.f32 %v653_v8, %v440_v14 }
 0x1d0   :  { %v473_v27 = vmax.f32 %v441_v25, 0.0 }
 0x1d2   :  { %v487_v28 = vpack.c.bf16 %v473_v27, %v472_v26 }
 0x1d5   :  { %v443_v29 = vpop.f32.mrf.mxu2 }
 0x1d6   :  { %v444_v30 = vadd.f32 %v653_v8, %v443_v29 }
 0x1d8   :  { %v474_v33 = vmax.f32 %v444_v30, 0.0 }
 0x1dd   :  { %v445_v31 = vpop.f32.mrf.mxu2 }
 0x1de   :  { %v446_v32 = vadd.f32 %v653_v8, %v445_v31 }
 0x1e0   :  { %v475_v34 = vmax.f32 %v446_v32, 0.0 }
 0x1e2   :  { %v488_v35 = vpack.c.bf16 %v475_v34, %v474_v33 }
 0x1e5   :  { %v448_v36 = vpop.f32.mrf.mxu2 }
 0x1e6   :  { %v449_v37 = vadd.f32 %v653_v8, %v448_v36 }
 0x1e8   :  { %v476_v40 = vmax.f32 %v449_v37, 0.0 }
 0x1ed   :  { %v450_v38 = vpop.f32.mrf.mxu2 }
 0x1ee   :  { %v451_v39 = vadd.f32 %v653_v8, %v450_v38 }
 0x1f0   :  { %v477_v41 = vmax.f32 %v451_v39, 0.0 }
 0x1f2   :  { %v489_v42 = vpack.c.bf16 %v477_v41, %v476_v40 }
 0x1f5   :  { %v453_v43 = vpop.f32.mrf.mxu2 }
 0x1f6   :  { %v454_v60 = vadd.f32 %v653_v8, %v453_v43 }
 0x1f8   :  { %v478_v62 = vmax.f32 %v454_v60, 0.0 }
 0x1fd   :  { %v455_v44 = vpop.f32.mrf.mxu2 }
 0x1fe   :  { %v456_v58 = vadd.f32 %v653_v8, %v455_v44 }
 0x200   :  { %v479_v61 = vmax.f32 %v456_v58, 0.0 }
 0x202   :  { %v490_v63 = vpack.c.bf16 %v479_v61, %v478_v62 }
 0x205   :  { %v458_v45 = vpop.f32.mrf.mxu2 }
 0x206   :  { %v459_v55 = vadd.f32 %v653_v8, %v458_v45 }
 0x208   :  { %v480_v57 = vmax.f32 %v459_v55, 0.0 }
 0x20d   :  { %v460_v46 = vpop.f32.mrf.mxu2 }
 0x20e   :  { %v461_v53 = vadd.f32 %v653_v8, %v460_v46 }
 0x210   :  { %v481_v56 = vmax.f32 %v461_v53, 0.0 }
 0x212   :  { %v491_v59 = vpack.c.bf16 %v481_v56, %v480_v57 }
 0x215   :  { %v463_v47 = vpop.f32.mrf.mxu2 }
 0x216   :  { %v464_v48 = vadd.f32 %v653_v8, %v463_v47 }
 0x218   :  { %v482_v51 = vmax.f32 %v464_v48, 0.0 }
 0x21d   :  { %v465_v49 = vpop.f32.mrf.mxu2 }
 0x21e   :  { %v466_v50 = vadd.f32 %v653_v8, %v465_v49 }
 0x220   :  { %v483_v52 = vmax.f32 %v466_v50, 0.0 }
 0x222   :  { %v492_v54 = vpack.c.bf16 %v483_v52, %v482_v51 }
 0x224   :  { %495 = vmatpush.bf16.xpose.msra.mxu3 %v492_v54 }
 0x22c   :  { %496 = vmatpush.bf16.xpose.msra.mxu3 %v491_v59 }
 0x234   :  { %497 = vmatpush.bf16.xpose.msra.mxu3 %v490_v63 }
 0x23c   :  { %498 = vmatpush.bf16.xpose.msra.mxu3 %v489_v42 }
 0x244   :  { %499 = vmatpush.bf16.xpose.msra.mxu3 %v488_v35 }
 0x24c   :  { %500 = vmatpush.bf16.xpose.msra.mxu3 %v487_v28 }
 0x254   :  { %501 = vmatpush.bf16.xpose.msra.mxu3 %v486_v22 }
 0x25c   :  { %502 = vmatpush.bf16.xpose.msra.mxu3 %v485_v15 }
 0x263   :  { %503 = vmatmul.bf16.vlgmr.msra.gmra.mxu3 %v484_v0 }
 0x2e6   :  { %v504_v2 = vpop.f32.mrf.mxu3 }
 0x2e7   :  { %v505_v3 = vadd.f32 %v504_v2, %v494_v1 }
 0x2e9   :  { %508 = vst [vmem:[#allocation6] sm:$0x1] %v505_v3 }
 0x2ea   :  { %519 = dma.vmem_to_hbm [thread:$0]  %s515_s10, 16, %s517_s0, [#allocation5]  }
 0x2ee   :  { %v506_v4 = vpop.f32.mrf.mxu3 }
 0x2ef   :  { %704 = dma.done.wait [#allocation5], 16  }
 0x2f0   :  { %705 = vsyncadd [#allocation5], 4294967280 }
 0x2f1   :  { %524 = vsyncpa [#allocation4], 1 }
 0x2f2   :  { %525 = vsyncpa [#allocation5], 1 }

</bundles_post_ra>
